<compile_context>
chip_gen: v7x
topology: tpu7x:2x2x1
jax: 0.10.0
libtpu: 0.0.40
codegen_flags: <defaults>
</compile_context>

<pallas_src>
import functools

import jax
import jax.numpy as jnp
from jax.experimental import pallas as pl
from jax.experimental.pallas import tpu as pltpu


_LANE = 128
_SUB_F32 = 8
_SUB_BF16 = 16
_MAX_TB_STREAM = 1024          # batch-tile cap, memory-bound D->1 projection path
_MAX_TB_MXU = 512              # batch-tile cap, (B,D)x(D,D) MXU path
_STREAM_X_BUDGET = 24 << 20    # VMEM budget for double-buffered x tiles
_MXU_VMEM_BUDGET = 40 << 20    # VMEM budget for resident W1 + x tiles (fits v7x 64MiB/TC)


def _round_up(n, m):
    return ((n + m - 1) // m) * m


def _pick_tile(b, max_tb, sub, min_tiles):
    """Balanced batch tile: minimizes tail padding, >= min_tiles grid steps."""
    n_tiles = max(-(-b // max_tb), min_tiles)
    return _round_up(-(-b // n_tiles), sub)


# ---------------- Pallas kernels ----------------

def _proj_kernel(x_ref, w_ref, b_ref, o_ref):
    # out[b] = sum_d x[b, d] * w[0, d] + b
    # VPU multiply + XLU lane reduce; a D->1 MXU matmul would run at <1% utilization.
    x = x_ref[...].astype(jnp.float32)                          # (TB, Dp)
    w = w_ref[...].astype(jnp.float32)                          # (1, Dp), VMEM-resident
    r = jnp.sum(x * w, axis=-1, keepdims=True) + b_ref[0, 0]    # (TB, 1)
    # Lane-dense store: one (1, TB) row per grid step (avoids masked (TB,1) stores).
    o_ref[...] = r.reshape(1, -1).astype(o_ref.dtype)


def _mlp2_kernel(x_ref, w1_ref, w2_ref, c_ref, o_ref):
    # h   = x @ W1                        (MXU, f32 accumulation)
    # out = sum_d h[:, d] * w2[0, d] + c  (VPU + XLU; c = b1 @ w2 + b2, precomputed)
    h = jnp.dot(x_ref[...], w1_ref[...], preferred_element_type=jnp.float32)  # (TB, Dp)
    w2 = w2_ref[...].astype(jnp.float32)                        # (1, Dp)
    r = jnp.sum(h * w2, axis=-1, keepdims=True) + c_ref[0, 0]   # (TB, 1)
    o_ref[...] = r.reshape(1, -1).astype(o_ref.dtype)


# ---------------- pallas_call drivers ----------------

def _run_projection(x, w_row, bias_scalar, compute_dtype):
    """out[b] = sum_d x[b, d] * w_row[d] + bias, streamed over batch tiles."""
    B, D = x.shape
    out_dtype = x.dtype
    xsz = jnp.dtype(compute_dtype).itemsize
    osz = jnp.dtype(out_dtype).itemsize
    sub = _SUB_BF16 if compute_dtype == jnp.bfloat16 else _SUB_F32
    Dp = max(_round_up(D, _LANE), _LANE)

    tb_cap = max(sub, (_STREAM_X_BUDGET // (2 * Dp * xsz)) // sub * sub)
    max_tb = min(_MAX_TB_STREAM, tb_cap)
    min_tiles = 2 if B >= 2 * sub else 1           # keep both v7x TCs busy when possible
    TB = _pick_tile(B, max_tb, sub, min_tiles)
    Bp = _round_up(B, TB)
    n_tiles = Bp // TB

    # Fast path: no host-side pad/cast (it doubles HBM traffic on this mem-bound path).
    if D == Dp and B == Bp and x.dtype == compute_dtype:
        xp = x
    else:
        xp = jnp.zeros((Bp, Dp), compute_dtype).at[:B, :D].set(x.astype(compute_dtype))

    wp = jnp.zeros((1, Dp), jnp.float32).at[0, :D].set(w_row.astype(jnp.float32))
    bsc = jnp.asarray(bias_scalar, dtype=jnp.float32).reshape(1, 1)

    need = 2 * TB * Dp * xsz + 2 * Dp * 4 + 2 * TB * osz + (1 << 16)
    ckw = dict(dimension_semantics=("parallel",))
    if need > (12 << 20):
        ckw["vmem_limit_bytes"] = int(min(need * 1.25 + (4 << 20), 128 << 20))
    cost = pl.CostEstimate(
        flops=2 * Bp * Dp, transcendentals=0,
        bytes_accessed=Bp * Dp * xsz + Dp * 4 + Bp * osz)

    out = pl.pallas_call(
        _proj_kernel,
        out_shape=jax.ShapeDtypeStruct((n_tiles, TB), out_dtype),
        grid=(n_tiles,),
        in_specs=[
            pl.BlockSpec((TB, Dp), lambda i: (i, 0)),              # streamed x tiles
            pl.BlockSpec((1, Dp), lambda i: (0, 0)),               # resident weight row
            pl.BlockSpec(memory_space=pltpu.MemorySpace.SMEM),     # scalar bias
        ],
        out_specs=pl.BlockSpec((1, TB), lambda i: (i, 0)),         # lane-dense rows
        compiler_params=pltpu.CompilerParams(**ckw),
        cost_estimate=cost,
    )(xp, wp, bsc)
    return out.reshape(-1, 1)[:B]


def _run_mlp2(x, w1, b1, w2, b2, compute_dtype):
    """Explicit two-step path: (x @ W1) * w2 summed, hidden bias folded into a scalar."""
    B, D = x.shape
    out_dtype = x.dtype
    csz = jnp.dtype(compute_dtype).itemsize
    osz = jnp.dtype(out_dtype).itemsize
    sub = _SUB_BF16 if compute_dtype == jnp.bfloat16 else _SUB_F32
    Dp = max(_round_up(D, _LANE), _LANE)

    w1_bytes = Dp * Dp * csz
    # TODO(synk): when 2*W1 exceeds the per-generation VMEM budget (v7x: 64 MiB/TC),
    # switch to an N-tiled grid (weight-column axis last, "arbitrary", (TB,1) f32
    # accumulator scratch) instead of a fully resident W1.
    rem = max(_MXU_VMEM_BUDGET - 2 * w1_bytes, 2 * sub * Dp * csz)
    tb_cap = max(sub, (rem // (2 * Dp * csz)) // sub * sub)
    max_tb = min(_MAX_TB_MXU, tb_cap)
    min_tiles = 2 if B >= 2 * sub else 1
    TB = _pick_tile(B, max_tb, sub, min_tiles)
    Bp = _round_up(B, TB)
    n_tiles = Bp // TB

    if D == Dp and B == Bp and x.dtype == compute_dtype:
        xp = x
    else:
        xp = jnp.zeros((Bp, Dp), compute_dtype).at[:B, :D].set(x.astype(compute_dtype))

    w1p = jnp.zeros((Dp, Dp), compute_dtype).at[:D, :D].set(w1.astype(compute_dtype))
    w2p = jnp.zeros((1, Dp), jnp.float32).at[0, :D].set(w2[:, 0].astype(jnp.float32))
    # Fold the hidden bias: (x@W1 + b1)@w2 + b2 == (x@W1)@w2 + (b1@w2 + b2).
    c = (b1.astype(jnp.float32) @ w2.astype(jnp.float32)
         + b2.astype(jnp.float32)).reshape(1, 1)

    need = 2 * TB * Dp * csz + 2 * w1_bytes + 2 * Dp * 4 + 2 * TB * osz + (1 << 16)
    ckw = dict(dimension_semantics=("parallel",))
    if need > (12 << 20):
        ckw["vmem_limit_bytes"] = int(min(need * 1.25 + (4 << 20), 128 << 20))
    cost = pl.CostEstimate(
        flops=2 * Bp * Dp * Dp + 2 * Bp * Dp, transcendentals=0,
        bytes_accessed=Bp * Dp * csz + w1_bytes + Dp * 4 + Bp * osz)

    out = pl.pallas_call(
        _mlp2_kernel,
        out_shape=jax.ShapeDtypeStruct((n_tiles, TB), out_dtype),
        grid=(n_tiles,),
        in_specs=[
            pl.BlockSpec((TB, Dp), lambda i: (i, 0)),              # streamed x tiles
            pl.BlockSpec((Dp, Dp), lambda i: (0, 0)),              # VMEM-resident W1
            pl.BlockSpec((1, Dp), lambda i: (0, 0)),               # resident w2 row
            pl.BlockSpec(memory_space=pltpu.MemorySpace.SMEM),     # scalar c
        ],
        out_specs=pl.BlockSpec((1, TB), lambda i: (i, 0)),         # lane-dense rows
        compiler_params=pltpu.CompilerParams(**ckw),
        cost_estimate=cost,
    )(xp, w1p, w2p, c)
    return out.reshape(-1, 1)[:B]


# ---------------- Wrapper ----------------

@functools.partial(jax.jit, static_argnames=("num_layers", "use_bf16", "collapse"))
def weak_classifier_forward(x, params, num_layers=1, use_bf16=True, collapse=True):
    """Forward pass of WeakClassifier.

    x: (B, D) float32
    params (num_layers == 1): {"w": (D, 1), "b": (1, 1)}
    params (num_layers == 2): {"w1": (D, D), "b1": (1, D), "w2": (D, 1), "b2": (1, 1)}
    returns: (B, 1)
    """
    if num_layers == 1:
        w, b = params["w"], params["b"]
        return _run_projection(x, w[:, 0], b.reshape(()), x.dtype)
    elif num_layers == 2:
        w1, b1, w2, b2 = params["w1"], params["b1"], params["w2"], params["b2"]
        if collapse:
            # No activation -> collapse to a single D->1 projection (review's top item).
            v = (w1.astype(jnp.float32) @ w2.astype(jnp.float32))[:, 0]        # (D,)
            c = (b1.astype(jnp.float32) @ w2.astype(jnp.float32)
                 + b2.astype(jnp.float32)).reshape(())
            return _run_projection(x, v, c, x.dtype)
        cdt = jnp.bfloat16 if use_bf16 else jnp.float32
        return _run_mlp2(x, w1, b1, w2, b2, cdt)
    else:
        raise ValueError("num_layers must be 1 or 2")


# ---------------- Deterministic parameter init (mimics nn.Linear default) ----------------

def init_params(key, input_dim, num_layers):
    def linear_init(k, fan_in, fan_out):
        bound = 1.0 / jnp.sqrt(jnp.float32(fan_in))
        kw, kb = jax.random.split(k)
        # stored pre-transposed: (in, out)
        w = jax.random.uniform(kw, (fan_in, fan_out), jnp.float32, -bound, bound)
        b = jax.random.uniform(kb, (1, fan_out), jnp.float32, -bound, bound)
        return w, b

    if num_layers == 1:
        w, b = linear_init(key, input_dim, 1)
        return {"w": w, "b": b}
    else:
        k1, k2 = jax.random.split(key)
        w1, b1 = linear_init(k1, input_dim, input_dim)
        w2, b2 = linear_init(k2, input_dim, 1)
        return {"w1": w1, "b1": b1, "w2": w2, "b2": b2}


# ---------------- Demo / self-check ----------------

if __name__ == "__main__":
    key = jax.random.PRNGKey(0)
    kx, kp1, kp2 = jax.random.split(key, 3)

    B, D = 8, 32  # small synthetic shapes
    x = jax.random.normal(kx, (B, D), jnp.float32)

    # 1-layer variant
    p1 = init_params(kp1, D, num_layers=1)
    y1 = jax.block_until_ready(weak_classifier_forward(x, p1, num_layers=1))
    ref1 = x @ p1["w"] + p1["b"]
    assert y1.shape == (B, 1)
    assert jnp.allclose(y1, ref1, atol=1e-5, rtol=1e-5)

    # 2-layer reference
    p2 = init_params(kp2, D, num_layers=2)
    ref2 = (x @ p2["w1"] + p2["b1"]) @ p2["w2"] + p2["b2"]

    # 2-layer, default algebraically-collapsed path (single D->1 projection kernel)
    y2 = jax.block_until_ready(weak_classifier_forward(x, p2, num_layers=2))
    assert y2.shape == (B, 1)
    assert jnp.allclose(y2, ref2, atol=1e-4, rtol=1e-4)

    # 2-layer, explicit two-step MXU kernel, f32 operands
    y2f = jax.block_until_ready(
        weak_classifier_forward(x, p2, num_layers=2, collapse=False, use_bf16=False))
    assert y2f.shape == (B, 1)
    assert jnp.allclose(y2f, ref2, atol=1e-4, rtol=1e-4)

    # 2-layer, explicit two-step MXU kernel, bf16 operands (default), f32 accumulation
    y2b = jax.block_until_ready(
        weak_classifier_forward(x, p2, num_layers=2, collapse=False))
    assert y2b.shape == (B, 1)
    assert jnp.allclose(y2b, ref2, atol=5e-2, rtol=5e-2)

    print("KERNEL_OK")
</pallas_src>

<mosaic_0001>
module attributes {stable_mosaic.version = 11 : i64} {
  func.func @_proj_kernel(%arg0: i32, %arg1: memref<8x128xf32, #tpu.memory_space<vmem>>, %arg2: memref<1x128xf32, #tpu.memory_space<vmem>>, %arg3: memref<1x1xf32, #tpu.memory_space<smem>>, %arg4: memref<1x8xf32, #tpu.memory_space<vmem>>) attributes {dimension_semantics = [#tpu.dimension_semantics<parallel>], iteration_bounds = array<i64: 1>, scalar_prefetch = 0 : i64, scratch_operands = 0 : i64, tpu.core_type = #tpu.core_type<tc>, window_params = [{transform_indices = @transform_0, window_bounds = array<i64: 8, 128>}, {pipeline_mode = #tpu.pipeline_mode<synchronous>, transform_indices = @transform_1, window_bounds = array<i64: 1, 128>}, {transform_indices = @transform_2, window_bounds = array<i64: 1, 1>}, {transform_indices = @transform_3, window_bounds = array<i64: 1, 8>}]} {
    %c0 = arith.constant 0 : index
    %c0_0 = arith.constant 0 : index
    %0 = vector.load %arg1[%c0, %c0_0] : memref<8x128xf32, #tpu.memory_space<vmem>>, vector<8x128xf32>
    %c0_1 = arith.constant 0 : index
    %c0_2 = arith.constant 0 : index
    %1 = vector.load %arg2[%c0_1, %c0_2] : memref<1x128xf32, #tpu.memory_space<vmem>>, vector<1x128xf32>
    %2 = vector.broadcast %1 : vector<1x128xf32> to vector<8x128xf32>
    %3 = arith.mulf %0, %2 : vector<8x128xf32>
    %cst = arith.constant dense<0.000000e+00> : vector<8xf32>
    %4 = vector.multi_reduction <add>, %3, %cst [1] : vector<8x128xf32> to vector<8xf32>
    %5 = vector.shape_cast %4 : vector<8xf32> to vector<8x1xf32>
    %c0_3 = arith.constant 0 : index
    %c0_4 = arith.constant 0 : index
    %6 = memref.load %arg3[%c0_3, %c0_4] : memref<1x1xf32, #tpu.memory_space<smem>>
    %7 = vector.broadcast %6 : f32 to vector<8x1xf32>
    %8 = arith.addf %5, %7 : vector<8x1xf32>
    %9 = vector.shape_cast %8 : vector<8x1xf32> to vector<1x8xf32>
    %c0_5 = arith.constant 0 : index
    %c0_6 = arith.constant 0 : index
    %10 = vector.load %arg4[%c0_5, %c0_6] : memref<1x8xf32, #tpu.memory_space<vmem>>, vector<1x8xf32>
    tpu.vector_store %arg4[%c0_5, %c0_6], %9 {strides = array<i32>} : memref<1x8xf32, #tpu.memory_space<vmem>>, vector<1x8xf32>,
    return
  }
  func.func @transform_0(%arg0: i32) -> (i32, i32) {
    %c0_i32 = arith.constant 0 : i32
    %c0_i32_0 = arith.constant 0 : i32
    return %arg0, %c0_i32 : i32, i32
  }
  func.func @transform_1(%arg0: i32) -> (i32, i32) {
    %c0_i32 = arith.constant 0 : i32
    %c0_i32_0 = arith.constant 0 : i32
    %c0_i32_1 = arith.constant 0 : i32
    return %c0_i32, %c0_i32_0 : i32, i32
  }
  func.func @transform_2(%arg0: i32) -> (i32, i32) {
    %c0_i32 = arith.constant 0 : i32
    %c0_i32_0 = arith.constant 0 : i32
    %c0_i32_1 = arith.constant 0 : i32
    return %c0_i32, %c0_i32_0 : i32, i32
  }
  func.func @transform_3(%arg0: i32) -> (i32, i32) {
    %c0_i32 = arith.constant 0 : i32
    %c0_i32_0 = arith.constant 0 : i32
    return %arg0, %c0_i32 : i32, i32
  }
}

</mosaic_0001>

<bundles_post_ra>
// kernel: weak_classifier_forward.1
= control target key start
LH: loop header
LB: loop body
LE: loop exit
PB: predicated region body
PF: predicated region fallthrough
CT: control target
= control target key end

     0   :  { %s122_s0 = inlined_call_operand.vmem [shape: f32[8,128], index: 0, kind: input, shape index: {}]   ;;  %s123_s1 = inlined_call_operand.vmem [shape: f32[1,128], index: 1, kind: input, shape index: {}]   ;;  %s124_s2 = inlined_call_operand.<no memory space> [shape: f32[1,1], index: 2, kind: input, shape index: {}]   ;;  %s125_s3 = inlined_call_operand.hbm [shape: f32[1,8], index: 3, kind: output, shape index: {}]  }
   0x1   :  { %v16_v0 = vld [vmem:[%s122_s0] sm:$0xff] }
   0x2   :  { %v54_v1 = vld [vmem:[%s123_s1] ss:$0 sm:$0xff] }
   0x3   :  { %9 = vsyncpa [#allocation4], 0  ;;  %v24_v2 = vmul.f32 %v54_v1, %v16_v0  ;;  %v31_v3 = vlaneseq  ;;  %v28_v6 = vstv %s124_s2  ;;  %s80_s18 = smov [#allocation3]   ;;  %vm38_vm0 = vcmask 57344  }
   0x4   :  { %s46_s19 = sshll.u32 %s80_s18, 4  ;;  %s47_s19 = int_to_ptr.vmem [resolvable:$true] %s46_s19 }
   0x5   :  { %25 = vadd.xlane.f32.xlu0 %v24_v2  ;;  %v32_v4 = vand.u32 127, %v31_v3  ;;  %v34_v5 = vshrl.u32 %v31_v3, 7  ;;  %s56_s0 = scalar_lea.vmem %s47_s19, 16  ;;  %s60_s1 = scalar_lea.vmem %s47_s19, 32 }
   0x6   :  { %p57_p0 = scmp.ne.s32.totalorder %s47_s19, %s56_s0  ;;  %p61_p1 = scmp.lt.s32.totalorder %s47_s19, %s47_s19 }
   0x7   :  { %v35_v7 = vsub.s32 %v32_v4, %v34_v5  ;;  %p62_p2 = scmp.lt.s32.totalorder %s60_s1, %s56_s0 }
   0x9   :  { %p63_p3 = por %p62_p2, %p61_p1 }
   0xb   :  { %p64_p4 = pnand %p63_p3, %p57_p0 }
  0x92   :  { %v26_v8 = vpop.xlane.xlu0 %25 }
  0x93   :  { %v29_v9 = vadd.f32 %v28_v6, %v26_v8 }
  0x95   :  { %v36_v10 = vrot.slane %v29_v9, %v35_v7 }
  0x97   :  { %39 = vst.msk [vmem:[#allocation3] sm:$0x1] %vm38_vm0, %v36_v10 }
  0x98   :  { %67 = shalt.err (!%p64_p4)
}
  0x99   :  { %s68_s2 = scalar_lea.hbm %s125_s3, 16 }
  0x9a   :  { %p69_p5 = scmp.ne.s32.totalorder %s125_s3, %s68_s2  ;;  %p72_p6 = scmp.lt.u32.totalorder %s68_s2, %s125_s3 }
  0x9c   :  { %p74_p7 = pnand %p72_p6, %p69_p5 }
  0x9e   :  { %77 = shalt.err (!%p74_p7)
}
  0x9f   :  { %49 = dma.vmem_to_hbm [thread:$0]  %s47_s19, 16, %s125_s3, [#allocation4]  }
  0xa0   :  { %78 = dma.done.wait [#allocation4], 16  }
  0xa1   :  { %79 = vsyncadd [#allocation4], 4294967280 }
  0xa2   :  { %53 = vsyncpa [#allocation4], 1 }

</bundles_post_ra>
